<compile_context>
chip_gen: v6e
topology: v6e:2x2x1
jax: 0.10.0
libtpu: 0.0.40
codegen_flags: <defaults>
</compile_context>

<pallas_src>
import functools

import jax
import jax.numpy as jnp
from jax.experimental import pallas as pl
from jax.experimental.pallas import tpu as pltpu

OUT_DIM = 5      # fixed by the module (self.output_dim = 5)
LANE = 128       # TPU vreg lane width
SUBLANE = 8      # TPU vreg sublane count


def _round_up(n, m):
    return (n + m - 1) // m * m


def ffnn_kernel(x_ref, w1_ref, b1_ref, w2_ref, b2_ref, o_ref):
    # x: (Bt, D) f32; W1: (D, Hp); b1: (1, Hp); W2: (Hp, Cp); b2: (1, Cp)
    x = x_ref[...]

    # Hidden layer: h = relu(x @ W1 + b1)   (Hp lane-dense, padded cols are 0)
    h = jnp.dot(x, w1_ref[...], preferred_element_type=jnp.float32) + b1_ref[...]
    h = jnp.maximum(h, 0.0)

    # Output layer: z = h @ W2 + b2, then mask padded class lanes to -inf via
    # a lane iota (robust even if padded W2 columns / h are not exactly 0).
    z = jnp.dot(h, w2_ref[...], preferred_element_type=jnp.float32) + b2_ref[...]
    lane = jax.lax.broadcasted_iota(jnp.int32, z.shape, dimension=1)
    z = jnp.where(lane < OUT_DIM, z, -jnp.inf)

    # Log-softmax over the class axis (exp(-inf) == 0 on padded lanes).
    m = jnp.max(z, axis=-1, keepdims=True)
    s = z - m
    lse = jnp.log(jnp.sum(jnp.exp(s), axis=-1, keepdims=True))
    out = s - lse

    if o_ref.shape[-1] == out.shape[-1]:
        o_ref[...] = out                       # lane-dense 128-wide slab
    else:
        o_ref[...] = out[:, : o_ref.shape[-1]]  # narrow: only the 5 real lanes


def pad_params(w1, b1, w2, b2):
    """Pad weights to lane-dense shapes. w1:(D,H) b1:(H,) w2:(H,5) b2:(5,)."""
    d, h = w1.shape
    hp = _round_up(h, LANE)
    cp = _round_up(OUT_DIM, LANE)
    w1p = jnp.zeros((d, hp), jnp.float32).at[:, :h].set(w1)
    b1p = jnp.zeros((1, hp), jnp.float32).at[:, :h].set(b1.reshape(1, h))
    w2p = jnp.zeros((hp, cp), jnp.float32).at[:h, :OUT_DIM].set(w2)
    b2p = jnp.zeros((1, cp), jnp.float32).at[:, :OUT_DIM].set(b2.reshape(1, OUT_DIM))
    return w1p, b1p, w2p, b2p
    # TODO(synk): for large input_dim/hidden, store x/W1/W2 in bf16 (keep
    # preferred_element_type=f32 in the dots, elementwise in f32) and mark the
    # resident weight specs with pipeline_mode=pl.Buffered(1) to halve their
    # VMEM footprint (binding on v7x's 64 MiB); add a K-reduction grid axis
    # with a pl.when-initialized f32 accumulator.


@functools.partial(
    jax.jit, static_argnames=("block_b", "lane_dense_out", "use_core_parallel")
)
def ffnn_forward_batched(
    x, w1p, b1p, w2p, b2p, *, block_b=512, lane_dense_out=False, use_core_parallel=False
):
    """x: (B, input_dim) f32 -> (B, 5) f32 log-probabilities (per row)."""
    b, d = x.shape
    hp = w1p.shape[1]
    cp = w2p.shape[1]

    # Batch tile: always a multiple of 8 sublanes, capped at block_b.
    bt = _round_up(min(block_b, b), SUBLANE)
    bp = _round_up(b, bt)
    # Only pad the ragged tail; skip the copy entirely when B divides evenly.
    xp = x if bp == b else jnp.pad(x, ((0, bp - b), (0, 0)))

    out_cols = cp if lane_dense_out else OUT_DIM
    grid = (bp // bt,)
    dim_sem = (pltpu.CORE_PARALLEL,) if use_core_parallel else ("parallel",)

    cost = pl.CostEstimate(
        flops=2 * bp * (d * hp + hp * cp),
        transcendentals=bp * (cp + 1),  # exp per class lane + log per row
        bytes_accessed=4 * (bp * d + d * hp + hp + hp * cp + cp + bp * out_cols),
    )

    out = pl.pallas_call(
        ffnn_kernel,
        out_shape=jax.ShapeDtypeStruct((bp, out_cols), jnp.float32),
        grid=grid,
        in_specs=[
            pl.BlockSpec((bt, d), lambda i: (i, 0)),    # x row tile
            pl.BlockSpec((d, hp), lambda i: (0, 0)),    # W1 (resident)
            pl.BlockSpec((1, hp), lambda i: (0, 0)),    # b1
            pl.BlockSpec((hp, cp), lambda i: (0, 0)),   # W2 (resident)
            pl.BlockSpec((1, cp), lambda i: (0, 0)),    # b2
        ],
        out_specs=pl.BlockSpec((bt, out_cols), lambda i: (i, 0)),
        compiler_params=pltpu.CompilerParams(dimension_semantics=dim_sem),
        cost_estimate=cost,
    )(xp, w1p, b1p, w2p, b2p)

    if lane_dense_out:
        return out[:b, :OUT_DIM]
    return out if bp == b else out[:b]


def ffnn_forward(x, w1p, b1p, w2p, b2p):
    """Single-vector forward matching the module: x:(input_dim,) -> (5,)."""
    return ffnn_forward_batched(
        x.reshape(1, -1), w1p, b1p, w2p, b2p, block_b=SUBLANE
    ).reshape(OUT_DIM)


def init_params(key, input_dim, h, out_dim=OUT_DIM):
    """Deterministic init matching nn.Linear's default U(-1/sqrt(fan_in), +)."""
    k1, k2, k3, k4 = jax.random.split(key, 4)
    bound1 = 1.0 / jnp.sqrt(jnp.float32(input_dim))
    bound2 = 1.0 / jnp.sqrt(jnp.float32(h))
    w1 = jax.random.uniform(k1, (input_dim, h), jnp.float32, -bound1, bound1)
    b1 = jax.random.uniform(k2, (h,), jnp.float32, -bound1, bound1)
    w2 = jax.random.uniform(k3, (h, out_dim), jnp.float32, -bound2, bound2)
    b2 = jax.random.uniform(k4, (out_dim,), jnp.float32, -bound2, bound2)
    return w1, b1, w2, b2


def ffnn_reference(x2d, w1, b1, w2, b2):
    h = jnp.maximum(x2d @ w1 + b1[None, :], 0.0)
    z = h @ w2 + b2[None, :]
    return jax.nn.log_softmax(z, axis=-1)


if __name__ == "__main__":
    input_dim = 32
    hidden = 32
    batch = 64

    key = jax.random.PRNGKey(0)
    k_params, k_input = jax.random.split(key)
    w1, b1, w2, b2 = init_params(k_params, input_dim, hidden)
    w1p, b1p, w2p, b2p = pad_params(w1, b1, w2, b2)

    xb = jax.random.normal(k_input, (batch, input_dim), jnp.float32)
    ref_b = ffnn_reference(xb, w1, b1, w2, b2)

    # Default path: large batch tile, narrow (B, 5) output, no pad copy.
    out_b = jax.block_until_ready(ffnn_forward_batched(xb, w1p, b1p, w2p, b2p))
    assert out_b.shape == (batch, OUT_DIM)
    assert jnp.allclose(out_b, ref_b, atol=1e-5, rtol=1e-5), (out_b[:2], ref_b[:2])

    # Multi-tile grid (block_b=16 -> 4 grid steps), still no pad copy.
    out_m = jax.block_until_ready(
        ffnn_forward_batched(xb, w1p, b1p, w2p, b2p, block_b=16)
    )
    assert jnp.allclose(out_m, ref_b, atol=1e-5, rtol=1e-5)

    # Lane-dense 128-wide output slab (benchmark alternative for v6e/v7x).
    out_ld = jax.block_until_ready(
        ffnn_forward_batched(xb, w1p, b1p, w2p, b2p, lane_dense_out=True)
    )
    assert jnp.allclose(out_ld, ref_b, atol=1e-5, rtol=1e-5)

    # Single-vector path (exact module semantics: 1-D in, 1-D log-probs out).
    x1 = xb[0]
    out_1 = jax.block_until_ready(ffnn_forward(x1, w1p, b1p, w2p, b2p))
    ref_1 = ffnn_reference(x1[None, :], w1, b1, w2, b2).reshape(OUT_DIM)
    assert out_1.shape == (OUT_DIM,)
    assert jnp.allclose(out_1, ref_1, atol=1e-5, rtol=1e-5), (out_1, ref_1)

    print("KERNEL_OK")
</pallas_src>

<mosaic_0001>
module attributes {stable_mosaic.version = 11 : i64} {
  func.func @ffnn_kernel(%arg0: i32, %arg1: memref<64x32xf32, #tpu.memory_space<vmem>>, %arg2: memref<32x128xf32, #tpu.memory_space<vmem>>, %arg3: memref<1x128xf32, #tpu.memory_space<vmem>>, %arg4: memref<128x128xf32, #tpu.memory_space<vmem>>, %arg5: memref<1x128xf32, #tpu.memory_space<vmem>>, %arg6: memref<64x5xf32, #tpu.memory_space<vmem>>) attributes {dimension_semantics = [#tpu.dimension_semantics<parallel>], iteration_bounds = array<i64: 1>, scalar_prefetch = 0 : i64, scratch_operands = 0 : i64, tpu.core_type = #tpu.core_type<tc>, window_params = [{transform_indices = @transform_0, window_bounds = array<i64: 64, 32>}, {pipeline_mode = #tpu.pipeline_mode<synchronous>, transform_indices = @transform_1, window_bounds = array<i64: 32, 128>}, {pipeline_mode = #tpu.pipeline_mode<synchronous>, transform_indices = @transform_2, window_bounds = array<i64: 1, 128>}, {pipeline_mode = #tpu.pipeline_mode<synchronous>, transform_indices = @transform_3, window_bounds = array<i64: 128, 128>}, {pipeline_mode = #tpu.pipeline_mode<synchronous>, transform_indices = @transform_4, window_bounds = array<i64: 1, 128>}, {transform_indices = @transform_5, window_bounds = array<i64: 64, 5>}]} {
    %c0 = arith.constant 0 : index
    %c0_0 = arith.constant 0 : index
    %0 = vector.load %arg1[%c0, %c0_0] : memref<64x32xf32, #tpu.memory_space<vmem>>, vector<64x32xf32>
    %c0_1 = arith.constant 0 : index
    %c0_2 = arith.constant 0 : index
    %1 = vector.load %arg2[%c0_1, %c0_2] : memref<32x128xf32, #tpu.memory_space<vmem>>, vector<32x128xf32>
    %cst = arith.constant dense<0.000000e+00> : vector<64x128xf32>
    %2 = tpu.matmul %0, %1, %cst {dimension_numbers = #tpu.dot_dimension_numbers<[1], [0], [0], [1], [0, 0, 1, 1], [], []>} : vector<64x32xf32>, vector<32x128xf32>, vector<64x128xf32> -> vector<64x128xf32>
    %c0_3 = arith.constant 0 : index
    %c0_4 = arith.constant 0 : index
    %3 = vector.load %arg3[%c0_3, %c0_4] : memref<1x128xf32, #tpu.memory_space<vmem>>, vector<1x128xf32>
    %4 = vector.broadcast %3 : vector<1x128xf32> to vector<64x128xf32>
    %5 = arith.addf %2, %4 : vector<64x128xf32>
    %cst_5 = arith.constant 0.000000e+00 : f32
    %6 = vector.broadcast %cst_5 : f32 to vector<64x128xf32>
    %7 = arith.maximumf %5, %6 : vector<64x128xf32>
    %c0_6 = arith.constant 0 : index
    %c0_7 = arith.constant 0 : index
    %8 = vector.load %arg4[%c0_6, %c0_7] : memref<128x128xf32, #tpu.memory_space<vmem>>, vector<128x128xf32>
    %cst_8 = arith.constant dense<0.000000e+00> : vector<64x128xf32>
    %9 = tpu.matmul %7, %8, %cst_8 {dimension_numbers = #tpu.dot_dimension_numbers<[1], [0], [0], [1], [0, 0, 1, 1], [], []>} : vector<64x128xf32>, vector<128x128xf32>, vector<64x128xf32> -> vector<64x128xf32>
    %c0_9 = arith.constant 0 : index
    %c0_10 = arith.constant 0 : index
    %10 = vector.load %arg5[%c0_9, %c0_10] : memref<1x128xf32, #tpu.memory_space<vmem>>, vector<1x128xf32>
    %11 = vector.broadcast %10 : vector<1x128xf32> to vector<64x128xf32>
    %12 = arith.addf %9, %11 : vector<64x128xf32>
    %13 = tpu.iota {dimensions = array<i32: 1>} : vector<64x128xi32>
    %c5_i32 = arith.constant 5 : i32
    %14 = vector.broadcast %c5_i32 : i32 to vector<64x128xi32>
    %15 = arith.cmpi slt, %13, %14 : vector<64x128xi32>
    %cst_11 = arith.constant 0xFF800000 : f32
    %16 = vector.broadcast %cst_11 : f32 to vector<64x128xf32>
    %17 = arith.select %15, %12, %16 : vector<64x128xi1>, vector<64x128xf32>
    %cst_12 = arith.constant dense<0xFF800000> : vector<64xf32>
    %18 = vector.multi_reduction <maximumf>, %17, %cst_12 [1] : vector<64x128xf32> to vector<64xf32>
    %19 = vector.shape_cast %18 : vector<64xf32> to vector<64x1xf32>
    %20 = vector.broadcast %19 : vector<64x1xf32> to vector<64x128xf32>
    %21 = arith.subf %17, %20 : vector<64x128xf32>
    %22 = math.exp %21 : vector<64x128xf32>
    %cst_13 = arith.constant dense<0.000000e+00> : vector<64xf32>
    %23 = vector.multi_reduction <add>, %22, %cst_13 [1] : vector<64x128xf32> to vector<64xf32>
    %24 = vector.shape_cast %23 : vector<64xf32> to vector<64x1xf32>
    %25 = math.log %24 : vector<64x1xf32>
    %26 = vector.broadcast %25 : vector<64x1xf32> to vector<64x128xf32>
    %27 = arith.subf %21, %26 : vector<64x128xf32>
    %28 = vector.extract_strided_slice %27 {offsets = [0, 0], sizes = [64, 5], strides = [1, 1]} : vector<64x128xf32> to vector<64x5xf32>
    %c0_14 = arith.constant 0 : index
    %c0_15 = arith.constant 0 : index
    %29 = vector.load %arg6[%c0_14, %c0_15] : memref<64x5xf32, #tpu.memory_space<vmem>>, vector<64x5xf32>
    tpu.vector_store %arg6[%c0_14, %c0_15], %28 {strides = array<i32>} : memref<64x5xf32, #tpu.memory_space<vmem>>, vector<64x5xf32>,
    return
  }
  func.func @transform_0(%arg0: i32) -> (i32, i32) {
    %c0_i32 = arith.constant 0 : i32
    %c0_i32_0 = arith.constant 0 : i32
    return %arg0, %c0_i32 : i32, i32
  }
  func.func @transform_1(%arg0: i32) -> (i32, i32) {
    %c0_i32 = arith.constant 0 : i32
    %c0_i32_0 = arith.constant 0 : i32
    %c0_i32_1 = arith.constant 0 : i32
    return %c0_i32, %c0_i32_0 : i32, i32
  }
  func.func @transform_2(%arg0: i32) -> (i32, i32) {
    %c0_i32 = arith.constant 0 : i32
    %c0_i32_0 = arith.constant 0 : i32
    %c0_i32_1 = arith.constant 0 : i32
    return %c0_i32, %c0_i32_0 : i32, i32
  }
  func.func @transform_3(%arg0: i32) -> (i32, i32) {
    %c0_i32 = arith.constant 0 : i32
    %c0_i32_0 = arith.constant 0 : i32
    %c0_i32_1 = arith.constant 0 : i32
    return %c0_i32, %c0_i32_0 : i32, i32
  }
  func.func @transform_4(%arg0: i32) -> (i32, i32) {
    %c0_i32 = arith.constant 0 : i32
    %c0_i32_0 = arith.constant 0 : i32
    %c0_i32_1 = arith.constant 0 : i32
    return %c0_i32, %c0_i32_0 : i32, i32
  }
  func.func @transform_5(%arg0: i32) -> (i32, i32) {
    %c0_i32 = arith.constant 0 : i32
    %c0_i32_0 = arith.constant 0 : i32
    return %arg0, %c0_i32 : i32, i32
  }
}

</mosaic_0001>

<bundles_post_ra>
// kernel: ffnn_forward_batched.1
= control target key start
LH: loop header
LB: loop body
LE: loop exit
PB: predicated region body
PF: predicated region fallthrough
CT: control target
= control target key end

     0   :  { %10 = vsyncpa [#allocation3], 0  ;;  %s623_s18 = smov [#allocation2]   ;;  %s781_s0 = inlined_call_operand.vmem [shape: f32[64,32], index: 0, kind: input, shape index: {}]   ;;  %s782_s1 = inlined_call_operand.vmem [shape: f32[32,128], index: 1, kind: input, shape index: {}]   ;;  %s783_s2 = inlined_call_operand.vmem [shape: f32[1,128], index: 2, kind: input, shape index: {}]   ;;  %s784_s3 = inlined_call_operand.hbm [shape: f32[128,128], index: 3, kind: input, shape index: {}]   ;;  %s785_s4 = inlined_call_operand.vmem [shape: f32[1,128], index: 4, kind: input, shape index: {}]   ;;  %s786_s5 = inlined_call_operand.vmem [shape: f32[64,5], index: 5, kind: output, shape index: {}]  }
   0x1   :  { %s22_s19 = sshll.u32 %s623_s18, 4  ;;  %s23_s19 = int_to_ptr.vmem [resolvable:$true] %s22_s19 }
   0x2   :  { %s609_s20 = scalar_lea.vmem %s23_s19, 2048  ;;  %p614_p1 = scmp.lt.s32.totalorder %s23_s19, %s23_s19 }
   0x3   :  { %p610_p0 = scmp.ne.s32.totalorder %s23_s19, %s609_s20  ;;  %p615_p2 = scmp.lt.s32.totalorder %s609_s20, %s609_s20 }
   0x5   :  { %p616_p3 = por %p615_p2, %p614_p1 }
   0x7   :  { %p617_p4 = pnand %p616_p3, %p610_p0 }
   0x9   :  { %620 = shalt.err (!%p617_p4)
}
   0xa   :  { %s624_s21 = smov 128   ;;  %s625_s22 = smov 8  }
   0xb   :  { %28 = dma.hbm_to_vmem [thread:$0]  %s784_s3, 2048, %s23_s19, [#allocation3], %s624_s21, %s624_s21, %s625_s22  }
   0xc   :  { %621 = dma.done.wait [#allocation3], 2048  }
   0xd   :  { %622 = vsyncadd [#allocation3], 4294965248  ;;  %vm53_vm0 = vcmask 261120   ;;  %v45_v0 = vld [vmem:[%s782_s1 + $0x18] sm:$0xff]  ;;  %v44_v1 = vld [vmem:[%s782_s1 + $0x10] sm:$0xff]  ;;  %v319_v53 = vlaneseq  ;;  %vm410_vm2 = vcmask 39936  }
   0xe   :  { %470 = vmatprep.subr.mxu0 %v45_v0  ;;  %v34_v2 = vld [vmem:[%s781_s0] sm:$0xff]  ;;  %v43_v3 = vld [vmem:[%s782_s1 + $0x8] sm:$0xff]  ;;  %v206_v5 = vld [vmem:[#allocation2 + $0x78] sm:$0xff] }
   0xf   :  { %471 = vmatpush3.msra.mxu0 %v45_v0  ;;  %478 = vmatprep.mubr.msk.f32.mxu0 %vm53_vm0, %v34_v2  ;;  %v42_v4 = vld [vmem:[%s782_s1] sm:$0xff]  ;;  %v35_v6 = vld [vmem:[%s781_s0 + $0x8] sm:$0xff]  ;;  %v205_v7 = vld [vmem:[#allocation2 + $0x70] sm:$0xff]  ;;  %v320_v54 = vand.u32 127, %v319_v53 }
  0x10   :  { %472 = vmatprep.subr.mxu0 %v44_v1  ;;  %534 = vmatprep.subr.mxu1 %v206_v5  ;;  %v36_v8 = vld [vmem:[%s781_s0 + $0x10] sm:$0xff]  ;;  %v37_v9 = vld [vmem:[%s781_s0 + $0x18] sm:$0xff]  ;;  %v204_v10 = vld [vmem:[#allocation2 + $0x68] sm:$0xff] }
  0x11   :  { %473 = vmatpush3.msra.mxu0 %v44_v1  ;;  %550 = vmatpush3.msra.mxu1 %v206_v5  ;;  %v38_v11 = vld [vmem:[%s781_s0 + $0x20] sm:$0xff]  ;;  %v39_v13 = vld [vmem:[%s781_s0 + $0x28] sm:$0xff]  ;;  %v202_v14 = vld [vmem:[#allocation2 + $0x58] sm:$0xff]  ;;  %vm321_vm1 = vcmp.lt.s32.totalorder %v320_v54, 5 }
  0x12   :  { %474 = vmatprep.subr.mxu0 %v43_v3  ;;  %535 = vmatprep.subr.mxu1 %v205_v7  ;;  %v203_v12 = vld [vmem:[#allocation2 + $0x60] sm:$0xff]  ;;  %v40_v15 = vld [vmem:[%s781_s0 + $0x30] sm:$0xff]  ;;  %v41_v17 = vld [vmem:[%s781_s0 + $0x38] sm:$0xff] }
  0x13   :  { %475 = vmatpush3.msra.mxu0 %v43_v3  ;;  %551 = vmatpush3.msra.mxu1 %v205_v7  ;;  %v201_v16 = vld [vmem:[#allocation2 + $0x50] sm:$0xff]  ;;  %v200_v18 = vld [vmem:[#allocation2 + $0x48] sm:$0xff]  ;;  %v199_v19 = vld [vmem:[#allocation2 + $0x40] sm:$0xff] }
  0x14   :  { %476 = vmatprep.subr.mxu0 %v42_v4  ;;  %536 = vmatprep.subr.mxu1 %v204_v10  ;;  %v198_v20 = vld [vmem:[#allocation2 + $0x38] sm:$0xff]  ;;  %v197_v21 = vld [vmem:[#allocation2 + $0x30] sm:$0xff]  ;;  %v196_v22 = vld [vmem:[#allocation2 + $0x28] sm:$0xff] }
  0x15   :  { %477 = vmatpush3.msra.mxu0 %v42_v4  ;;  %552 = vmatpush3.msra.mxu1 %v204_v10  ;;  %v195_v23 = vld [vmem:[#allocation2 + $0x20] sm:$0xff]  ;;  %v194_v24 = vld [vmem:[#allocation2 + $0x18] sm:$0xff]  ;;  %v193_v25 = vld [vmem:[#allocation2 + $0x10] sm:$0xff] }
  0x16   :  { %479 = vmatmul.mubr.msk.f32.vlgmr.msra.gmra.mxu0 %vm53_vm0, %v35_v6  ;;  %490 = vmatprep.subr.mxu0 %v206_v5  ;;  %v192_v26 = vld [vmem:[#allocation2 + $0x8] sm:$0xff]  ;;  %v191_v27 = vld [vmem:[#allocation2] sm:$0xff] }
  0x17   :  { %481 = vmatprep.mubr.msk.f32.mxu0 %vm53_vm0, %v36_v8  ;;  %491 = vmatpush3.msra.mxu0 %v206_v5  ;;  %v424_v28 = vld [vmem:[%s783_s2] ss:$0 sm:$0xff] }
  0x18   :  { %492 = vmatprep.subr.mxu0 %v205_v7  ;;  %537 = vmatprep.subr.mxu1 %v203_v12  ;;  %v433_v55 = vld [vmem:[%s785_s4] ss:$0 sm:$0xff] }
  0x19   :  { %493 = vmatpush3.msra.mxu0 %v205_v7  ;;  %553 = vmatpush3.msra.mxu1 %v203_v12 }
  0x1a   :  { %482 = vmatmul.mubr.msk.f32.gmra.mxu0 %vm53_vm0, %v37_v9  ;;  %494 = vmatprep.subr.mxu0 %v204_v10 }
  0x1b   :  { %484 = vmatprep.mubr.msk.f32.mxu0 %vm53_vm0, %v38_v11  ;;  %495 = vmatpush3.msra.mxu0 %v204_v10 }
  0x1c   :  { %496 = vmatprep.subr.mxu0 %v203_v12  ;;  %538 = vmatprep.subr.mxu1 %v202_v14 }
  0x1d   :  { %497 = vmatpush3.msra.mxu0 %v203_v12  ;;  %554 = vmatpush3.msra.mxu1 %v202_v14 }
  0x1e   :  { %485 = vmatmul.mubr.msk.f32.gmra.mxu0 %vm53_vm0, %v39_v13  ;;  %498 = vmatprep.subr.mxu0 %v202_v14 }
  0x1f   :  { %487 = vmatprep.mubr.msk.f32.mxu0 %vm53_vm0, %v40_v15  ;;  %499 = vmatpush3.msra.mxu0 %v202_v14 }
  0x20   :  { %500 = vmatprep.subr.mxu0 %v201_v16  ;;  %539 = vmatprep.subr.mxu1 %v201_v16 }
  0x21   :  { %501 = vmatpush3.msra.mxu0 %v201_v16  ;;  %555 = vmatpush3.msra.mxu1 %v201_v16 }
  0x22   :  { %488 = vmatmul.mubr.msk.f32.gmra.mxu0 %vm53_vm0, %v41_v17  ;;  %502 = vmatprep.subr.mxu0 %v200_v18 }
  0x23   :  { %503 = vmatpush3.msra.mxu0 %v200_v18  ;;  %540 = vmatprep.subr.mxu1 %v200_v18 }
  0x24   :  { %504 = vmatprep.subr.mxu0 %v199_v19  ;;  %556 = vmatpush3.msra.mxu1 %v200_v18 }
  0x25   :  { %505 = vmatpush3.msra.mxu0 %v199_v19  ;;  %541 = vmatprep.subr.mxu1 %v199_v19 }
  0x26   :  { %506 = vmatprep.subr.mxu0 %v198_v20  ;;  %557 = vmatpush3.msra.mxu1 %v199_v19 }
  0x27   :  { %507 = vmatpush3.msra.mxu0 %v198_v20  ;;  %542 = vmatprep.subr.mxu1 %v198_v20 }
  0x28   :  { %508 = vmatprep.subr.mxu0 %v197_v21  ;;  %558 = vmatpush3.msra.mxu1 %v198_v20 }
  0x29   :  { %509 = vmatpush3.msra.mxu0 %v197_v21  ;;  %543 = vmatprep.subr.mxu1 %v197_v21 }
  0x2a   :  { %510 = vmatprep.subr.mxu0 %v196_v22  ;;  %559 = vmatpush3.msra.mxu1 %v197_v21 }
  0x2b   :  { %511 = vmatpush3.msra.mxu0 %v196_v22  ;;  %544 = vmatprep.subr.mxu1 %v196_v22 }
  0x2c   :  { %512 = vmatprep.subr.mxu0 %v195_v23  ;;  %560 = vmatpush3.msra.mxu1 %v196_v22 }
  0x2d   :  { %513 = vmatpush3.msra.mxu0 %v195_v23  ;;  %545 = vmatprep.subr.mxu1 %v195_v23 }
  0x2e   :  { %561 = vmatpush3.msra.mxu1 %v195_v23  ;;  %514 = vmatprep.subr.mxu0 %v194_v24 }
  0x2f   :  { %546 = vmatprep.subr.mxu1 %v194_v24  ;;  %515 = vmatpush3.msra.mxu0 %v194_v24 }
  0x30   :  { %562 = vmatpush3.msra.mxu1 %v194_v24  ;;  %516 = vmatprep.subr.mxu0 %v193_v25 }
  0x31   :  { %547 = vmatprep.subr.mxu1 %v193_v25  ;;  %517 = vmatpush3.msra.mxu0 %v193_v25 }
  0x32   :  { %563 = vmatpush3.msra.mxu1 %v193_v25  ;;  %518 = vmatprep.subr.mxu0 %v192_v26 }
  0x33   :  { %548 = vmatprep.subr.mxu1 %v192_v26  ;;  %519 = vmatpush3.msra.mxu0 %v192_v26 }
  0x34   :  { %564 = vmatpush3.msra.mxu1 %v192_v26  ;;  %520 = vmatprep.subr.mxu0 %v191_v27 }
  0x35   :  { %549 = vmatprep.subr.mxu1 %v191_v27  ;;  %521 = vmatpush3.msra.mxu0 %v191_v27 }
  0x36   :  { %565 = vmatpush3.msra.mxu1 %v191_v27 }
  0xd6   :  { %v480_v29 = vpop.f32.mrf.mxu0 }
  0xd7   :  { %v150_v30 = vadd.f32 %v480_v29, %v424_v28 }
  0xd8   :  { %v144_v31 = vpop.f32.mrf.mxu0 }
  0xd9   :  { %v145_v32 = vadd.f32 %v424_v28, %v144_v31  ;;  %v184_v35 = vmax.f32 %v150_v30, 0.0 }
  0xda   :  { %v483_v33 = vpop.f32.mrf.mxu0 }
  0xdb   :  { %v183_v34 = vmax.f32 %v145_v32, 0.0  ;;  %v160_v36 = vadd.f32 %v483_v33, %v424_v28 }
  0xdc   :  { %v154_v37 = vpop.f32.mrf.mxu0 }
  0xdd   :  { %522 = vmatprep.mubr.f32.mxu0 %v183_v34  ;;  %v155_v38 = vadd.f32 %v424_v28, %v154_v37  ;;  %v186_v42 = vmax.f32 %v160_v36, 0.0 }
  0xde   :  { %v486_v39 = vpop.f32.mrf.mxu0  ;;  %523 = vmatmul.mubr.f32.vlgmr.msra.gmra.mxu0 %v184_v35 }
  0xdf   :  { %v170_v40 = vadd.f32 %v486_v39, %v424_v28  ;;  %v185_v41 = vmax.f32 %v155_v38, 0.0 }
  0xe0   :  { %v164_v43 = vpop.f32.mrf.mxu0 }
  0xe1   :  { %v165_v44 = vadd.f32 %v424_v28, %v164_v43  ;;  %525 = vmatprep.mubr.f32.mxu1 %v185_v41  ;;  %v188_v45 = vmax.f32 %v170_v40, 0.0 }
  0xe2   :  { %v489_v46 = vpop.f32.mrf.mxu0  ;;  %526 = vmatmul.mubr.f32.vlgmr.msra.gmra.mxu1 %v186_v42 }
  0xe3   :  { %v187_v47 = vmax.f32 %v165_v44, 0.0  ;;  %v180_v48 = vadd.f32 %v489_v46, %v424_v28 }
  0xe4   :  { %v174_v49 = vpop.f32.mrf.mxu0 }
  0xe5   :  { %v175_v50 = vadd.f32 %v424_v28, %v174_v49  ;;  %528 = vmatprep.mubr.f32.mxu1 %v187_v47  ;;  %v190_v51 = vmax.f32 %v180_v48, 0.0 }
  0xe6   :  { %529 = vmatmul.mubr.f32.gmra.mxu1 %v188_v45 }
  0xe7   :  { %v189_v52 = vmax.f32 %v175_v50, 0.0 }
  0xe9   :  { %531 = vmatprep.mubr.f32.mxu1 %v189_v52 }
  0xea   :  { %532 = vmatmul.mubr.f32.gmra.mxu1 %v190_v51 }
 0x19e   :  { %v524_v56 = vpop.f32.mrf.mxu0 }
 0x19f   :  { %v286_v57 = vadd.f32 %v524_v56, %v433_v55 }
 0x1a0   :  { %v280_v58 = vpop.f32.mrf.mxu0 }
 0x1a1   :  { %v281_v59 = vadd.f32 %v433_v55, %v280_v58  ;;  %v323_v60 = vsel %vm321_vm1, %v286_v57, -inf }
 0x1a2   :  { %v527_v61 = vpop.f32.mrf.mxu1  ;;  %332 = vmax.xlane.f32.xlu0 %v323_v60 }
 0x1a3   :  { %v296_v62 = vadd.f32 %v527_v61, %v433_v55  ;;  %v322_v2 = vsel %vm321_vm1, %v281_v59, -inf }
 0x1a4   :  { %v290_v63 = vpop.f32.mrf.mxu1 }
 0x1a5   :  { %v291_v0 = vadd.f32 %v433_v55, %v290_v63  ;;  %v325_v1 = vsel %vm321_vm1, %v296_v62, -inf }
 0x1a6   :  { %336 = vmax.xlane.f32.xlu1 %v325_v1  ;;  %v530_v3 = vpop.f32.mrf.mxu1  ;;  %330 = vmax.xlane.f32.xlu0 %v322_v2 }
 0x1a7   :  { %v306_v5 = vadd.f32 %v530_v3, %v433_v55  ;;  %v324_v7 = vsel %vm321_vm1, %v291_v0, -inf }
 0x1a8   :  { %v300_v4 = vpop.f32.mrf.mxu1 }
 0x1a9   :  { %v301_v6 = vadd.f32 %v433_v55, %v300_v4  ;;  %v327_v13 = vsel %vm321_vm1, %v306_v5, -inf }
 0x1aa   :  { %v533_v8 = vpop.f32.mrf.mxu1  ;;  %334 = vmax.xlane.f32.xlu1 %v324_v7 }
 0x1ab   :  { %v326_v9 = vsel %vm321_vm1, %v301_v6, -inf  ;;  %v316_v11 = vadd.f32 %v533_v8, %v433_v55 }
 0x1ac   :  { %v310_v10 = vpop.f32.mrf.mxu1  ;;  %338 = vmax.xlane.f32.xlu0 %v326_v9 }
 0x1ad   :  { %v311_v12 = vadd.f32 %v433_v55, %v310_v10  ;;  %v329_v15 = vsel %vm321_vm1, %v316_v11, -inf }
 0x1ae   :  { %340 = vmax.xlane.f32.xlu1 %v327_v13 }
 0x1af   :  { %v328_v14 = vsel %vm321_vm1, %v311_v12, -inf }
 0x1b0   :  { %342 = vmax.xlane.f32.xlu0 %v328_v14 }
 0x1b2   :  { %344 = vmax.xlane.f32.xlu1 %v329_v15 }
 0x22b   :  { %v333_v16 = vpop.xlane.xlu0 %332 }
 0x22c   :  { %v717_v17 = vsub.f32 %v323_v60, %v333_v16 }
 0x22e   :  { %v356_v18 = vmul.f32 1.442695, %v717_v17 }
 0x22f   :  { %v337_v19 = vpop.xlane.xlu1 %336  ;;  %v331_v20 = vpop.xlane.xlu0 %330 }
 0x230   :  { %569 = vpow2.f32 %v356_v18  ;;  %v720_v21 = vsub.f32 %v325_v1, %v337_v19  ;;  %v722_v22 = vsub.f32 %v322_v2, %v331_v20 }
 0x232   :  { %v360_v23 = vmul.f32 1.442695, %v720_v21  ;;  %v354_v24 = vmul.f32 1.442695, %v722_v22 }
 0x233   :  { %v335_v25 = vpop.xlane.xlu1 %334 }
 0x234   :  { %571 = vpow2.f32 %v360_v23  ;;  %v726_v26 = vsub.f32 %v324_v7, %v335_v25 }
 0x235   :  { %573 = vpow2.f32 %v354_v24  ;;  %v339_v27 = vpop.xlane.xlu0 %338 }
 0x236   :  { %v358_v28 = vmul.f32 1.442695, %v726_v26  ;;  %v729_v29 = vsub.f32 %v326_v9, %v339_v27 }
 0x237   :  { %v341_v30 = vpop.xlane.xlu1 %340 }
 0x238   :  { %575 = vpow2.f32 %v358_v28  ;;  %v731_v31 = vsub.f32 %v327_v13, %v341_v30  ;;  %v362_v32 = vmul.f32 1.442695, %v729_v29 }
 0x239   :  { %v343_v33 = vpop.xlane.xlu0 %342 }
 0x23a   :  { %v364_v34 = vmul.f32 1.442695, %v731_v31  ;;  %v735_v35 = vsub.f32 %v328_v14, %v343_v33 }
 0x23b   :  { %v345_v36 = vpop.xlane.xlu1 %344 }
 0x23c   :  { %577 = vpow2.f32 %v364_v34  ;;  %v737_v37 = vsub.f32 %v329_v15, %v345_v36  ;;  %v366_v39 = vmul.f32 1.442695, %v735_v35 }
 0x23d   :  { %v570_v38 = vpop.eup %569  ;;  %579 = vpow2.f32 %v362_v32 }
 0x23e   :  { %v368_v40 = vmul.f32 1.442695, %v737_v37  ;;  %372 = vadd.xlane.f32.xlu1 %v570_v38 }
 0x240   :  { %581 = vpow2.f32 %v368_v40 }
 0x241   :  { %v572_v41 = vpop.eup %571  ;;  %583 = vpow2.f32 %v366_v39 }
 0x242   :  { %v574_v42 = vpop.eup %573  ;;  %376 = vadd.xlane.f32.xlu1 %v572_v41 }
 0x243   :  { %370 = vadd.xlane.f32.xlu0 %v574_v42 }
 0x245   :  { %v576_v43 = vpop.eup %575 }
 0x247   :  { %374 = vadd.xlane.f32.xlu0 %v576_v43 }
 0x249   :  { %v578_v44 = vpop.eup %577 }
 0x24a   :  { %v580_v45 = vpop.eup %579  ;;  %380 = vadd.xlane.f32.xlu1 %v578_v44 }
 0x24b   :  { %378 = vadd.xlane.f32.xlu0 %v580_v45 }
 0x24d   :  { %v582_v46 = vpop.eup %581 }
 0x24e   :  { %v584_v47 = vpop.eup %583  ;;  %384 = vadd.xlane.f32.xlu1 %v582_v46 }
 0x24f   :  { %382 = vadd.xlane.f32.xlu0 %v584_v47 }
 0x2c7   :  { %v373_v48 = vpop.xlane.xlu1 %372 }
 0x2c8   :  { %585 = vlog2.f32 %v373_v48 }
 0x2cb   :  { %v377_v49 = vpop.xlane.xlu1 %376 }
 0x2cc   :  { %587 = vlog2.f32 %v377_v49  ;;  %v371_v50 = vpop.xlane.xlu0 %370 }
 0x2cd   :  { %589 = vlog2.f32 %v371_v50 }
 0x2d0   :  { %v375_v51 = vpop.xlane.xlu0 %374 }
 0x2d1   :  { %591 = vlog2.f32 %v375_v51 }
 0x2d3   :  { %v381_v52 = vpop.xlane.xlu1 %380 }
 0x2d4   :  { %593 = vlog2.f32 %v381_v52  ;;  %v379_v53 = vpop.xlane.xlu0 %378 }
 0x2d5   :  { %v586_v54 = vpop.eup %585  ;;  %595 = vlog2.f32 %v379_v53 }
 0x2d6   :  { %v389_v55 = vmul.f32 0.6931472, %v586_v54 }
 0x2d7   :  { %v385_v56 = vpop.xlane.xlu1 %384 }
 0x2d8   :  { %v403_v57 = vsub.f32 %v717_v17, %v389_v55  ;;  %597 = vlog2.f32 %v385_v56  ;;  %v383_v58 = vpop.xlane.xlu0 %382 }
 0x2d9   :  { %v588_v59 = vpop.eup %587  ;;  %599 = vlog2.f32 %v383_v58 }
 0x2da   :  { %v590_v60 = vpop.eup %589  ;;  %412 = vst.msk [vmem:[%s786_s5 + $0x8] sm:$0xff] %vm410_vm2, %v403_v57  ;;  %v393_v61 = vmul.f32 0.6931472, %v588_v59 }
 0x2db   :  { %v387_v62 = vmul.f32 0.6931472, %v590_v60 }
 0x2dc   :  { %v405_v63 = vsub.f32 %v720_v21, %v393_v61 }
 0x2dd   :  { %v402_v0 = vsub.f32 %v722_v22, %v387_v62 }
 0x2de   :  { %v592_v1 = vpop.eup %591  ;;  %414 = vst.msk [vmem:[%s786_s5 + $0x18] sm:$0xff] %vm410_vm2, %v405_v63 }
 0x2df   :  { %411 = vst.msk [vmem:[%s786_s5] sm:$0xff] %vm410_vm2, %v402_v0  ;;  %v391_v2 = vmul.f32 0.6931472, %v592_v1 }
 0x2e1   :  { %v594_v3 = vpop.eup %593  ;;  %v404_v4 = vsub.f32 %v726_v26, %v391_v2 }
 0x2e2   :  { %v596_v5 = vpop.eup %595  ;;  %v397_v6 = vmul.f32 0.6931472, %v594_v3 }
 0x2e3   :  { %413 = vst.msk [vmem:[%s786_s5 + $0x10] sm:$0xff] %vm410_vm2, %v404_v4  ;;  %v395_v7 = vmul.f32 0.6931472, %v596_v5 }
 0x2e4   :  { %v407_v8 = vsub.f32 %v731_v31, %v397_v6 }
 0x2e5   :  { %v598_v9 = vpop.eup %597  ;;  %v406_v10 = vsub.f32 %v729_v29, %v395_v7 }
 0x2e6   :  { %v600_v11 = vpop.eup %599  ;;  %416 = vst.msk [vmem:[%s786_s5 + $0x28] sm:$0xff] %vm410_vm2, %v407_v8  ;;  %v401_v12 = vmul.f32 0.6931472, %v598_v9 }
 0x2e7   :  { %415 = vst.msk [vmem:[%s786_s5 + $0x20] sm:$0xff] %vm410_vm2, %v406_v10  ;;  %v399_v13 = vmul.f32 0.6931472, %v600_v11 }
 0x2e8   :  { %v409_v14 = vsub.f32 %v737_v37, %v401_v12 }
 0x2e9   :  { %v408_v15 = vsub.f32 %v735_v35, %v399_v13 }
 0x2ea   :  { %418 = vst.msk [vmem:[%s786_s5 + $0x38] sm:$0xff] %vm410_vm2, %v409_v14 }
 0x2eb   :  { %417 = vst.msk [vmem:[%s786_s5 + $0x30] sm:$0xff] %vm410_vm2, %v408_v15 }
 0x2ec   :  { %423 = vsyncpa [#allocation3], 1 }

</bundles_post_ra>
